<compile_context>
chip_gen: v7x
topology: tpu7x:2x2x1
jax: 0.10.0
libtpu: 0.0.40
codegen_flags: <defaults>
</compile_context>

<pallas_src>
import functools

import jax
import jax.numpy as jnp
from jax import lax
from jax.experimental import pallas as pl
from jax.experimental.pallas import tpu as pltpu

LANE = 128
SUBLANE = 8
_WINDOW = 48
_DMAX_DEFAULT = 15.0


def _ceil_div(a, b):
    return -(-a // b)


def _tensorcores_per_chip():
    """2 on multi-TensorCore chips (v7x / v4 megacore), else 1 (v5e / v6e)."""
    # TODO(synk): on v7x, confirm the leading "parallel" grid axis really shards across
    # both TensorCores; if profiling shows it does not, switch that axis to
    # pltpu.CORE_PARALLEL (or pl.core_map with create_tensorcore_mesh).
    try:
        kind = jax.devices()[0].device_kind.lower()
    except Exception:
        return 1
    return 2 if ("v7" in kind or "7x" in kind or "v4" in kind) else 1


def _sublane_multiple(*dtypes):
    """Minimum second-to-last block multiple for the given input dtypes."""
    s = SUBLANE
    for dt in dtypes:
        if jnp.dtype(dt) == jnp.dtype(jnp.bfloat16):
            s = 16
    return s


# --------------------------------------------------------------------------
# Fused weighted-loss reduction:
#   loss = sum( lr * pred^2 * w_n  +  lr_pos * (dmax - pred)^2 * w_p )
# --------------------------------------------------------------------------
@functools.partial(jax.jit, static_argnames=("tile_rows", "n_cores"))
def _malis_weighted_loss_impl(pred, weights_n, weights_p, malis_lr, malis_lr_pos,
                              dmax, *, tile_rows, n_cores):
    n = pred.size
    n_main = (n // LANE) * LANE            # lane-aligned prefix handled by the kernel
    rows = n_main // LANE

    def _flat(x):
        x = x.reshape(-1)                  # free (contiguous) reshape, no copy
        if x.dtype not in (jnp.float32, jnp.bfloat16):
            x = x.astype(jnp.float32)      # only unsupported dtypes pay a cast
        return x

    p_flat = _flat(pred)
    wn_flat = _flat(weights_n)
    wp_flat = _flat(weights_p)

    def _xla_loss(pp, wwn, wwp):
        pp = pp.astype(jnp.float32)
        return jnp.sum(malis_lr * pp * pp * wwn.astype(jnp.float32)
                       + malis_lr_pos * (dmax - pp) ** 2 * wwp.astype(jnp.float32))

    sub = _sublane_multiple(p_flat.dtype, wn_flat.dtype, wp_flat.dtype)
    if rows < sub:
        # Tiny input: a kernel launch is all overhead; let XLA do it.
        return _xla_loss(p_flat, wn_flat, wp_flat)

    # Ragged tail (< 128 elements past the lane-aligned prefix): computed by XLA.
    # This (plus the in-kernel row mask below) replaces the old jnp.pad of all three
    # inputs, eliminating a full HBM read+write copy of each operand.
    if n_main < n:
        tail = _xla_loss(p_flat[n_main:], wn_flat[n_main:], wp_flat[n_main:])
    else:
        tail = jnp.zeros((), jnp.float32)

    # Lane-dense (rows, 128) views of the aligned prefix (no copy; the slice only
    # exists in the ragged case and is allowed to fuse into the kernel input DMA).
    p_2d = p_flat[:n_main].reshape(rows, LANE)
    wn_2d = wn_flat[:n_main].reshape(rows, LANE)
    wp_2d = wp_flat[:n_main].reshape(rows, LANE)

    # Tile rows: large blocks (1 MiB f32 at tr=2048) to amortize per-step pipeline
    # overhead; rounded to the dtype's sublane multiple; adaptive for small inputs;
    # never larger than the array so every block start stays in range.
    tr = min(tile_rows, _ceil_div(rows, n_cores))
    tr = _ceil_div(tr, sub) * sub
    tr = min(tr, (rows // sub) * sub)
    row_tiles = _ceil_div(rows, tr)
    tiles_per_core = _ceil_div(row_tiles, n_cores)
    last_blk = row_tiles - 1

    def in_map(c, i):
        # Clamp so a core whose logical range over-runs the row-block count never
        # requests an out-of-range block (its contribution is masked to zero below).
        return (jnp.minimum(c * tiles_per_core + i, last_blk), 0)

    def kernel(scal_ref, p_ref, wn_ref, wp_ref, out_ref):
        c = pl.program_id(0)
        i = pl.program_id(1)

        @pl.when(i == 0)
        def _():
            out_ref[...] = jnp.zeros_like(out_ref)

        lr = scal_ref[0]
        lrp = scal_ref[1]
        dm = scal_ref[2]

        p = p_ref[...].astype(jnp.float32)
        d = dm - p
        contrib = (lr * (p * p) * wn_ref[...].astype(jnp.float32)
                   + lrp * (d * d) * wp_ref[...].astype(jnp.float32))

        # Mask rows past the valid flattened extent: covers the ragged last tile
        # (inputs are NOT padded) and duplicate clamped blocks on the 2-core path.
        row0 = (c * tiles_per_core + i) * tr
        gidx = row0 + lax.broadcasted_iota(jnp.int32, (tr, LANE), 0)
        contrib = jnp.where(gidx < rows, contrib, 0.0)

        # Fold (tr,128) -> (8,128) with pure VALU adds (aligned with vreg tiles) and
        # accumulate into the resident output block: only 4 KiB written back per core.
        out_ref[0] = out_ref[0] + jnp.sum(
            contrib.reshape(tr // SUBLANE, SUBLANE, LANE), axis=0)

    scal = jnp.stack([malis_lr.astype(jnp.float32),
                      malis_lr_pos.astype(jnp.float32),
                      dmax.astype(jnp.float32)])

    bytes_in = (p_2d.size * p_2d.dtype.itemsize
                + wn_2d.size * wn_2d.dtype.itemsize
                + wp_2d.size * wp_2d.dtype.itemsize)

    partials = pl.pallas_call(
        kernel,
        out_shape=jax.ShapeDtypeStruct((n_cores, SUBLANE, LANE), jnp.float32),
        grid=(n_cores, tiles_per_core),
        in_specs=[
            pl.BlockSpec(memory_space=pltpu.MemorySpace.SMEM),   # [lr, lr_pos, dmax]
            pl.BlockSpec((tr, LANE), in_map),                    # pred
            pl.BlockSpec((tr, LANE), in_map),                    # weights_n
            pl.BlockSpec((tr, LANE), in_map),                    # weights_p
        ],
        out_specs=pl.BlockSpec((1, SUBLANE, LANE), lambda c, i: (c, 0, 0)),
        compiler_params=pltpu.CompilerParams(
            dimension_semantics=("parallel", "arbitrary"),
            # Allow XLA to fuse the (cheap) reshape/slice producers into the input DMAs.
            allow_input_fusion=[False, True, True, True],
            vmem_limit_bytes=32 * 1024 * 1024,
        ),
        cost_estimate=pl.CostEstimate(
            flops=10 * n_main, transcendentals=0,
            bytes_accessed=bytes_in + n_cores * SUBLANE * LANE * 4),
    )(scal, p_2d, wn_2d, wp_2d)

    # Tiny (n_cores * 8 * 128) final reduction; leave it to XLA.
    return jnp.sum(partials) + tail


def malis_weighted_loss(pred, weights_n, weights_p, malis_lr, malis_lr_pos,
                        dmax=_DMAX_DEFAULT, *, tile_rows=2048, n_cores=None):
    """sum(malis_lr * pred^2 * weights_n + malis_lr_pos * (dmax-pred)^2 * weights_p)."""
    if n_cores is None:
        n_cores = _tensorcores_per_chip()
    return _malis_weighted_loss_impl(
        pred, weights_n, weights_p,
        jnp.asarray(malis_lr, jnp.float32),
        jnp.asarray(malis_lr_pos, jnp.float32),
        jnp.asarray(dmax, jnp.float32),
        tile_rows=int(tile_rows), n_cores=int(n_cores))


# --------------------------------------------------------------------------
# MALIS window weights (graph part of the reference forward).
# --------------------------------------------------------------------------
def malis_window_weights(pred, target, window=_WINDOW):
    B, C, H, W = pred.shape
    if (H // window) >= 1 and (W // window) >= 1:
        # TODO(synk): the MALIS maximin edge-weight computation (skimage measure.label
        # connected components, scipy binary_dilation, malis.malis_loss_weights
        # union-find/Kruskal maximin traversal) is a sequential graph algorithm with no
        # Pallas/TPU equivalent; supply the weights externally for H, W >= window.
        raise NotImplementedError(
            f"MALIS window weights for spatial dims >= {window} are not implemented on TPU")
    # Reference windowed loops never execute -> weights are exactly zero.
    # Return None so the caller can skip the reduction instead of DMA-ing zeros.
    return None, None


# --------------------------------------------------------------------------
# MALISLoss_window_pos forward
# --------------------------------------------------------------------------
def malis_loss_window_pos(pred, target, malis_lr, malis_lr_pos, weights=None,
                          dmax=_DMAX_DEFAULT):
    wn, wp = malis_window_weights(pred, target)
    if wn is None:
        # Weights identically zero (spatial dims < 48 window): the reference result is
        # exactly 0.  No kernel launch, no HBM traffic for constant-zero arrays.
        return jnp.zeros((), jnp.float32)
    return malis_weighted_loss(pred, wn, wp, malis_lr, malis_lr_pos, dmax)


if __name__ == "__main__":
    key = jax.random.PRNGKey(0)
    kp, kt, kn, kq = jax.random.split(key, 4)

    # pred / target: (B, C, H, W), spatial < 48 so the MALIS window loops are empty.
    B, C, H, W = 2, 4, 32, 32
    dmax = _DMAX_DEFAULT
    malis_lr, malis_lr_pos = 0.5, 1.0

    pred = jax.random.uniform(kp, (B, C, H, W), jnp.float32) * dmax
    target = jnp.floor(jax.random.uniform(kt, (B, C, H, W), jnp.float32) * (dmax + 1.0))

    # 1) Faithful module forward: weights are exactly zero -> loss == 0.
    loss = jax.block_until_ready(malis_loss_window_pos(pred, target, malis_lr, malis_lr_pos))
    assert jnp.isfinite(loss) and float(loss) == 0.0, loss

    # 2) Fused Pallas reduction with deterministic synthetic (nonzero) weights standing
    #    in for real MALIS weights; lane-exact flat size (8192 = 64 * 128).
    wn = jax.random.uniform(kn, (B, C, H, W), jnp.float32)
    wp = jax.random.uniform(kq, (B, C, H, W), jnp.float32)
    out = jax.block_until_ready(
        malis_weighted_loss(pred, wn, wp, malis_lr, malis_lr_pos, dmax))
    ref = jnp.sum(malis_lr * pred ** 2 * wn + malis_lr_pos * (dmax - pred) ** 2 * wp)
    assert jnp.isfinite(out), out
    assert jnp.allclose(out, ref, rtol=1e-4, atol=1e-2), (out, ref)

    # 3) Ragged flat size (2*3*30*30 = 5400): exercises the no-pad path, i.e. the
    #    in-kernel row mask for the partial last tile plus the XLA-computed tail.
    B2, C2, H2, W2 = 2, 3, 30, 30
    k2p, k2n, k2q = jax.random.split(kp, 3)
    pred2 = jax.random.uniform(k2p, (B2, C2, H2, W2), jnp.float32) * dmax
    wn2 = jax.random.uniform(k2n, (B2, C2, H2, W2), jnp.float32)
    wp2 = jax.random.uniform(k2q, (B2, C2, H2, W2), jnp.float32)
    out2 = jax.block_until_ready(
        malis_weighted_loss(pred2, wn2, wp2, malis_lr, malis_lr_pos, dmax))
    ref2 = jnp.sum(malis_lr * pred2 ** 2 * wn2 + malis_lr_pos * (dmax - pred2) ** 2 * wp2)
    assert jnp.isfinite(out2), out2
    assert jnp.allclose(out2, ref2, rtol=1e-4, atol=1e-2), (out2, ref2)

    print("KERNEL_OK")
</pallas_src>

<mosaic_0001>
module attributes {stable_mosaic.version = 11 : i64} {
  func.func @kernel(%arg0: i32, %arg1: i32, %arg2: memref<3xf32, #tpu.memory_space<smem>>, %arg3: memref<64x128xf32, #tpu.memory_space<vmem>>, %arg4: memref<64x128xf32, #tpu.memory_space<vmem>>, %arg5: memref<64x128xf32, #tpu.memory_space<vmem>>, %arg6: memref<1x8x128xf32, #tpu.memory_space<vmem>>) attributes {dimension_semantics = [#tpu.dimension_semantics<parallel>, #tpu.dimension_semantics<arbitrary>], iteration_bounds = array<i64: 1, 1>, scalar_prefetch = 0 : i64, scratch_operands = 0 : i64, tpu.core_type = #tpu.core_type<tc>, window_params = [{transform_indices = @transform_0, window_bounds = array<i64: 3>}, {transform_indices = @transform_1, window_bounds = array<i64: 64, 128>}, {transform_indices = @transform_2, window_bounds = array<i64: 64, 128>}, {transform_indices = @transform_3, window_bounds = array<i64: 64, 128>}, {transform_indices = @transform_4, window_bounds = array<i64: 1, 8, 128>}]} {
    %c0_i32 = arith.constant 0 : i32
    %0 = arith.cmpi eq, %arg1, %c0_i32 : i32
    %1 = arith.extui %0 : i1 to i32
    %c0_i32_0 = arith.constant 0 : i32
    %2 = arith.cmpi ne, %1, %c0_i32_0 : i32
    scf.if %2 {
      %cst_15 = arith.constant 0.000000e+00 : f32
      %38 = vector.broadcast %cst_15 : f32 to vector<1x8x128xf32>
      %c0_16 = arith.constant 0 : index
      %c0_17 = arith.constant 0 : index
      %c0_18 = arith.constant 0 : index
      %39 = vector.load %arg6[%c0_16, %c0_17, %c0_18] : memref<1x8x128xf32, #tpu.memory_space<vmem>>, vector<1x8x128xf32>
      tpu.vector_store %arg6[%c0_16, %c0_17, %c0_18], %38 {strides = array<i32>} : memref<1x8x128xf32, #tpu.memory_space<vmem>>, vector<1x8x128xf32>,
    } else {
    }
    %c0 = arith.constant 0 : index
    %3 = memref.load %arg2[%c0] : memref<3xf32, #tpu.memory_space<smem>>
    %c1 = arith.constant 1 : index
    %4 = memref.load %arg2[%c1] : memref<3xf32, #tpu.memory_space<smem>>
    %c2 = arith.constant 2 : index
    %5 = memref.load %arg2[%c2] : memref<3xf32, #tpu.memory_space<smem>>
    %c0_1 = arith.constant 0 : index
    %c0_2 = arith.constant 0 : index
    %6 = vector.load %arg3[%c0_1, %c0_2] : memref<64x128xf32, #tpu.memory_space<vmem>>, vector<64x128xf32>
    %7 = vector.broadcast %5 : f32 to vector<64x128xf32>
    %8 = arith.subf %7, %6 : vector<64x128xf32>
    %9 = arith.mulf %6, %6 : vector<64x128xf32>
    %10 = vector.broadcast %3 : f32 to vector<64x128xf32>
    %11 = arith.mulf %10, %9 : vector<64x128xf32>
    %c0_3 = arith.constant 0 : index
    %c0_4 = arith.constant 0 : index
    %12 = vector.load %arg4[%c0_3, %c0_4] : memref<64x128xf32, #tpu.memory_space<vmem>>, vector<64x128xf32>
    %13 = arith.mulf %11, %12 : vector<64x128xf32>
    %14 = arith.mulf %8, %8 : vector<64x128xf32>
    %15 = vector.broadcast %4 : f32 to vector<64x128xf32>
    %16 = arith.mulf %15, %14 : vector<64x128xf32>
    %c0_5 = arith.constant 0 : index
    %c0_6 = arith.constant 0 : index
    %17 = vector.load %arg5[%c0_5, %c0_6] : memref<64x128xf32, #tpu.memory_space<vmem>>, vector<64x128xf32>
    %18 = arith.mulf %16, %17 : vector<64x128xf32>
    %19 = arith.addf %13, %18 : vector<64x128xf32>
    %c1_i32 = arith.constant 1 : i32
    %20 = arith.muli %arg0, %c1_i32 : i32
    %21 = arith.addi %20, %arg1 : i32
    %c64_i32 = arith.constant 64 : i32
    %22 = arith.muli %21, %c64_i32 : i32
    %23 = tpu.iota {dimensions = array<i32: 0>} : vector<64x128xi32>
    %24 = vector.broadcast %22 : i32 to vector<64x128xi32>
    %25 = arith.addi %24, %23 : vector<64x128xi32>
    %c64_i32_7 = arith.constant 64 : i32
    %26 = vector.broadcast %c64_i32_7 : i32 to vector<64x128xi32>
    %27 = arith.cmpi slt, %25, %26 : vector<64x128xi32>
    %cst = arith.constant 0.000000e+00 : f32
    %28 = vector.broadcast %cst : f32 to vector<64x128xf32>
    %29 = arith.select %27, %19, %28 : vector<64x128xi1>, vector<64x128xf32>
    %c0_8 = arith.constant 0 : index
    %c0_9 = arith.constant 0 : index
    %c0_10 = arith.constant 0 : index
    %30 = vector.load %arg6[%c0_8, %c0_9, %c0_10] : memref<1x8x128xf32, #tpu.memory_space<vmem>>, vector<1x8x128xf32>
    %31 = vector.shape_cast %30 : vector<1x8x128xf32> to vector<8x128xf32>
    %32 = vector.shape_cast %29 : vector<64x128xf32> to vector<8x8x128xf32>
    %cst_11 = arith.constant dense<0.000000e+00> : vector<8x128xf32>
    %33 = vector.multi_reduction <add>, %32, %cst_11 [0] : vector<8x8x128xf32> to vector<8x128xf32>
    %34 = arith.addf %31, %33 : vector<8x128xf32>
    %c0_12 = arith.constant 0 : index
    %c0_13 = arith.constant 0 : index
    %c0_14 = arith.constant 0 : index
    %35 = vector.load %arg6[%c0_12, %c0_13, %c0_14] : memref<1x8x128xf32, #tpu.memory_space<vmem>>, vector<1x8x128xf32>
    %36 = vector.shape_cast %35 : vector<1x8x128xf32> to vector<8x128xf32>
    %37 = vector.shape_cast %34 : vector<8x128xf32> to vector<1x8x128xf32>
    tpu.vector_store %arg6[%c0_12, %c0_13, %c0_14], %37 {strides = array<i32>} : memref<1x8x128xf32, #tpu.memory_space<vmem>>, vector<1x8x128xf32>,
    return
  }
  func.func @transform_0(%arg0: i32, %arg1: i32) -> i32 {
    %c0_i32 = arith.constant 0 : i32
    %c0_i32_0 = arith.constant 0 : i32
    return %c0_i32 : i32
  }
  func.func @transform_1(%arg0: i32, %arg1: i32) -> (i32, i32) {
    %c1_i32 = arith.constant 1 : i32
    %0 = arith.muli %arg0, %c1_i32 : i32
    %1 = arith.addi %0, %arg1 : i32
    %c0_i32 = arith.constant 0 : i32
    %2 = arith.minsi %1, %c0_i32 : i32
    %c0_i32_0 = arith.constant 0 : i32
    %c0_i32_1 = arith.constant 0 : i32
    return %2, %c0_i32_0 : i32, i32
  }
  func.func @transform_2(%arg0: i32, %arg1: i32) -> (i32, i32) {
    %c1_i32 = arith.constant 1 : i32
    %0 = arith.muli %arg0, %c1_i32 : i32
    %1 = arith.addi %0, %arg1 : i32
    %c0_i32 = arith.constant 0 : i32
    %2 = arith.minsi %1, %c0_i32 : i32
    %c0_i32_0 = arith.constant 0 : i32
    %c0_i32_1 = arith.constant 0 : i32
    return %2, %c0_i32_0 : i32, i32
  }
  func.func @transform_3(%arg0: i32, %arg1: i32) -> (i32, i32) {
    %c1_i32 = arith.constant 1 : i32
    %0 = arith.muli %arg0, %c1_i32 : i32
    %1 = arith.addi %0, %arg1 : i32
    %c0_i32 = arith.constant 0 : i32
    %2 = arith.minsi %1, %c0_i32 : i32
    %c0_i32_0 = arith.constant 0 : i32
    %c0_i32_1 = arith.constant 0 : i32
    return %2, %c0_i32_0 : i32, i32
  }
  func.func @transform_4(%arg0: i32, %arg1: i32) -> (i32, i32, i32) {
    %c0_i32 = arith.constant 0 : i32
    %c0_i32_0 = arith.constant 0 : i32
    %c0_i32_1 = arith.constant 0 : i32
    return %arg0, %c0_i32, %c0_i32_0 : i32, i32, i32
  }
}

</mosaic_0001>

<bundles_post_ra>
// kernel: _malis_weighted_loss_impl.1
= control target key start
LH: loop header
LB: loop body
LE: loop exit
PB: predicated region body
PF: predicated region fallthrough
CT: control target
= control target key end

     0   :  { %9 = vsyncpa [#allocation3], 0  ;;  %s429_s0 = inlined_call_operand.vmem [shape: f32[3], index: 0, kind: input, shape index: {}]   ;;  %s430_s1 = inlined_call_operand.vmem [shape: f32[64,128], index: 1, kind: input, shape index: {}]   ;;  %s431_s2 = inlined_call_operand.vmem [shape: f32[64,128], index: 2, kind: input, shape index: {}]   ;;  %s432_s3 = inlined_call_operand.vmem [shape: f32[64,128], index: 3, kind: input, shape index: {}]   ;;  %s433_s4 = inlined_call_operand.vmem [shape: f32[1,8,128], index: 4, kind: output, shape index: {}]  }
   0x1   :  { %s16_s17 = sshll.u32 %s429_s0, 4  ;;  %s17_s17 = int_to_ptr.vmem [resolvable:$true] %s16_s17 }
   0x2   :  { %s298_s18 = scalar_lea.vmem %s17_s17, 16  ;;  %p303_p1 = scmp.lt.s32.totalorder %s17_s17, %s17_s17 }
   0x3   :  { %p299_p0 = scmp.ne.s32.totalorder %s17_s17, %s298_s18  ;;  %p304_p2 = scmp.lt.s32.totalorder %s298_s18, %s298_s18 }
   0x5   :  { %p305_p3 = por %p304_p2, %p303_p1 }
   0x7   :  { %p306_p4 = pnand %p305_p3, %p299_p0 }
   0x9   :  { %309 = shalt.err (!%p306_p4)
}
   0xa   :  { %s312_s19 = smov [#allocation2]  }
   0xb   :  { %19 = dma.vmem_to_smem %s17_s17, 16, %s312_s19, [#allocation3]  }
   0xc   :  { %310 = dma.done.wait [#allocation3], 16  }
   0xd   :  { %311 = vsyncadd [#allocation3], 4294967280 }
   0xe   :  { %65 = sfence }
   0xf   :  { %s131_s20 = sld [smem:[#allocation2]]  ;;  %s295_s21 = sld [smem:[#allocation2 + $0x2]]  ;;  %v134_v0 = vld [vmem:[%s430_s1] sm:$0xff]  ;;  %v135_v1 = vld [vmem:[%s430_s1 + $0x8] sm:$0xff]  ;;  %v136_v4 = vld [vmem:[%s430_s1 + $0x10] sm:$0xff] }
  0x10   :  { %s341_s22 = sld [smem:[#allocation2 + $0x1]]  ;;  %v151_v2 = vmul.f32 %v134_v0, %v134_v0  ;;  %v152_v3 = vmul.f32 %v135_v1, %v135_v1  ;;  %v137_v5 = vld [vmem:[%s430_s1 + $0x18] sm:$0xff]  ;;  %v138_v7 = vld [vmem:[%s430_s1 + $0x20] sm:$0xff]  ;;  %v139_v8 = vld [vmem:[%s430_s1 + $0x28] sm:$0xff]  ;;  %v153_v11 = vmul.f32 %v136_v4, %v136_v4 }
  0x11   :  { %v140_v9 = vld [vmem:[%s430_s1 + $0x30] sm:$0xff]  ;;  %v154_v12 = vmul.f32 %v137_v5, %v137_v5  ;;  %v141_v13 = vld [vmem:[%s430_s1 + $0x38] sm:$0xff]  ;;  %v155_v14 = vmul.f32 %v138_v7, %v138_v7  ;;  %v156_v15 = vmul.f32 %v139_v8, %v139_v8  ;;  %v168_v22 = vld [vmem:[%s431_s2] sm:$0xff] }
  0x12   :  { %v157_v16 = vmul.f32 %v140_v9, %v140_v9  ;;  %v169_v27 = vld [vmem:[%s431_s2 + $0x8] sm:$0xff]  ;;  %v158_v29 = vmul.f32 %v141_v13, %v141_v13  ;;  %v170_v35 = vld [vmem:[%s431_s2 + $0x10] sm:$0xff]  ;;  %v171_v37 = vld [vmem:[%s431_s2 + $0x18] sm:$0xff] }
  0x13   :  { %v201_v46 = vld [vmem:[%s432_s3] sm:$0xff]  ;;  %v202_v47 = vld [vmem:[%s432_s3 + $0x8] sm:$0xff]  ;;  %v203_v48 = vld [vmem:[%s432_s3 + $0x10] sm:$0xff] }
  0x14   :  { %v172_v49 = vld [vmem:[%s431_s2 + $0x20] sm:$0xff]  ;;  %v204_v54 = vld [vmem:[%s432_s3 + $0x18] sm:$0xff]  ;;  %v173_v60 = vld [vmem:[%s431_s2 + $0x28] sm:$0xff] }
  0x15   :  { %v355_v6 = vstv %s131_s20  ;;  %v142_v10 = vstv %s295_s21  ;;  %v205_v59 = vld [vmem:[%s432_s3 + $0x20] sm:$0xff] }
  0x16   :  { %v160_v17 = vmul.f32 %v355_v6, %v151_v2  ;;  %v143_v18 = vsub.f32 %v142_v10, %v134_v0  ;;  %v144_v19 = vsub.f32 %v142_v10, %v135_v1  ;;  %v145_v20 = vsub.f32 %v142_v10, %v136_v4  ;;  %v206_v4 = vld [vmem:[%s432_s3 + $0x28] sm:$0xff] }
  0x17   :  { %v161_v21 = vmul.f32 %v355_v6, %v152_v3  ;;  %v146_v23 = vsub.f32 %v142_v10, %v137_v5  ;;  %v147_v24 = vsub.f32 %v142_v10, %v138_v7  ;;  %v148_v25 = vsub.f32 %v142_v10, %v139_v8 }
  0x18   :  { %v149_v26 = vsub.f32 %v142_v10, %v140_v9  ;;  %v150_v28 = vsub.f32 %v142_v10, %v141_v13  ;;  %v162_v30 = vmul.f32 %v355_v6, %v153_v11  ;;  %v192_v31 = vstv %s341_s22 }
  0x19   :  { %v163_v32 = vmul.f32 %v355_v6, %v154_v12  ;;  %v164_v33 = vmul.f32 %v355_v6, %v155_v14  ;;  %v165_v34 = vmul.f32 %v355_v6, %v156_v15  ;;  %v176_v36 = vmul.f32 %v168_v22, %v160_v17  ;;  %v174_v12 = vld [vmem:[%s431_s2 + $0x30] sm:$0xff] }
  0x1a   :  { %v177_v38 = vmul.f32 %v169_v27, %v161_v21  ;;  %v184_v39 = vmul.f32 %v143_v18, %v143_v18  ;;  %v185_v40 = vmul.f32 %v144_v19, %v144_v19  ;;  %v186_v41 = vmul.f32 %v145_v20, %v145_v20  ;;  %v207_v14 = vld [vmem:[%s432_s3 + $0x30] sm:$0xff]  ;;  %v175_v19 = vld [vmem:[%s431_s2 + $0x38] sm:$0xff] }
  0x1b   :  { %v187_v42 = vmul.f32 %v146_v23, %v146_v23  ;;  %v188_v43 = vmul.f32 %v147_v24, %v147_v24  ;;  %v189_v44 = vmul.f32 %v148_v25, %v148_v25  ;;  %v190_v45 = vmul.f32 %v149_v26, %v149_v26 }
  0x1c   :  { %v178_v50 = vmul.f32 %v170_v35, %v162_v30  ;;  %v193_v51 = vmul.f32 %v192_v31, %v184_v39  ;;  %v194_v52 = vmul.f32 %v192_v31, %v185_v40  ;;  %v195_v53 = vmul.f32 %v192_v31, %v186_v41 }
  0x1d   :  { %v179_v55 = vmul.f32 %v171_v37, %v163_v32  ;;  %v191_v56 = vmul.f32 %v150_v28, %v150_v28  ;;  %v196_v57 = vmul.f32 %v192_v31, %v187_v42  ;;  %v197_v58 = vmul.f32 %v192_v31, %v188_v43 }
  0x1e   :  { %v198_v61 = vmul.f32 %v192_v31, %v189_v44  ;;  %v209_v62 = vmul.f32 %v201_v46, %v193_v51  ;;  %v210_v63 = vmul.f32 %v202_v47, %v194_v52  ;;  %v211_v0 = vmul.f32 %v203_v48, %v195_v53 }
  0x1f   :  { %v166_v1 = vmul.f32 %v355_v6, %v157_v16  ;;  %v180_v2 = vmul.f32 %v172_v49, %v164_v33  ;;  %v199_v3 = vmul.f32 %v192_v31, %v190_v45  ;;  %v212_v5 = vmul.f32 %v204_v54, %v196_v57 }
  0x20   :  { %v213_v7 = vmul.f32 %v205_v59, %v197_v58  ;;  %v217_v8 = vadd.f32 %v209_v62, %v176_v36  ;;  %v218_v9 = vadd.f32 %v210_v63, %v177_v38  ;;  %v219_v10 = vadd.f32 %v211_v0, %v178_v50 }
  0x21   :  { %v167_v11 = vmul.f32 %v355_v6, %v158_v29  ;;  %v181_v13 = vmul.f32 %v173_v60, %v165_v34  ;;  %v200_v15 = vmul.f32 %v192_v31, %v191_v56  ;;  %v214_v16 = vmul.f32 %v206_v4, %v198_v61  ;;  %v208_v6 = vld [vmem:[%s432_s3 + $0x38] sm:$0xff] }
  0x22   :  { %v220_v17 = vadd.f32 %v212_v5, %v179_v55  ;;  %v262_v18 = vadd.f32 %v218_v9, %v217_v8  ;;  %v182_v20 = vmul.f32 %v174_v12, %v166_v1  ;;  %v215_v21 = vmul.f32 %v207_v14, %v199_v3 }
  0x23   :  { %v221_v22 = vadd.f32 %v213_v7, %v180_v2  ;;  %v183_v24 = vmul.f32 %v175_v19, %v167_v11  ;;  %v216_v25 = vmul.f32 %v208_v6, %v200_v15  ;;  %v222_v26 = vadd.f32 %v214_v16, %v181_v13 }
  0x24   :  { %v263_v23 = vadd.f32 %v262_v18, %v219_v10  ;;  %v223_v28 = vadd.f32 %v215_v21, %v182_v20 }
  0x25   :  { %v224_v30 = vadd.f32 %v216_v25, %v183_v24 }
  0x26   :  { %v264_v27 = vadd.f32 %v263_v23, %v220_v17 }
  0x28   :  { %v265_v29 = vadd.f32 %v264_v27, %v221_v22 }
  0x2a   :  { %v266_v31 = vadd.f32 %v265_v29, %v222_v26 }
  0x2c   :  { %v267_v32 = vadd.f32 %v266_v31, %v223_v28 }
  0x2e   :  { %v268_v33 = vadd.f32 %v267_v32, %v224_v30 }
  0x30   :  { %270 = vst [vmem:[%s433_s4] sm:$0xff] %v268_v33 }
  0x31   :  { %275 = vsyncpa [#allocation3], 1 }

</bundles_post_ra>
